<compile_context>
chip_gen: v6e
topology: v6e:2x2x1
jax: 0.10.0
libtpu: 0.0.40
codegen_flags: <defaults>
</compile_context>

<pallas_src>
import functools
import numpy as np
import jax
import jax.numpy as jnp
from jax.experimental import pallas as pl
from jax.experimental.pallas import tpu as pltpu

# Per-grid-step input-block byte target.  The op is purely HBM-bound, so block
# size is the dominant lever (amortizes the ~0.35 us fixed per-step overhead).
_TARGET_IN_BYTES = 6 * 1024 * 1024
_VMEM_HEADROOM = 4 * 1024 * 1024
_VMEM_FLOOR = 16 * 1024 * 1024
_VMEM_CEIL = 48 * 1024 * 1024        # stay well under v7x's 64 MiB physical VMEM


def _vmem_limit(in_block_bytes, out_block_bytes):
    # 2x (double buffering) * (input + output block) + headroom for internals.
    want = 2 * (in_block_bytes + out_block_bytes) + _VMEM_HEADROOM
    return int(min(_VMEM_CEIL, max(_VMEM_FLOOR, want)))


def _window_pool_kernel(x_ref, o_ref, *, pooling_type, size):
    """x_ref: (bB, T_blk, F); o_ref: (bB, kt, F). Non-overlapping time windows."""
    kt = o_ref.shape[1]
    need_max = pooling_type in ("max", "avg-max")
    need_avg = pooling_type in ("avg", "avg-max")

    def window_elem(j):
        # Rows j, j+size, ..., j+(kt-1)*size: the j-th element of every window,
        # fetched as ONE strided sublane load (no sublane reshape / relayout).
        # TODO(synk): for bf16/fp16 with odd `size` this strided load may force
        # a sublane unpack; switch to contiguous (bB, size, F) windows if the
        # bundle dump ever shows relayout copies (low priority: HBM-bound op).
        if size == 1:
            return x_ref[:, pl.ds(0, kt), :]
        return x_ref[:, pl.ds(j, kt, stride=size), :]

    x0 = window_elem(0)
    m = x0 if need_max else None                      # running max (input dtype)
    s = x0.astype(jnp.float32) if need_avg else None  # running sum (f32 accum)
    for j in range(1, size):
        xj = window_elem(j)
        if need_max:
            m = jnp.maximum(m, xj)
        if need_avg:
            s = s + xj.astype(jnp.float32)

    if pooling_type == "max":
        out = m
    elif pooling_type == "avg":
        out = s * (1.0 / size)
    else:  # 'avg-max' = max_pool + avg_pool, from the same pass over the data
        out = m.astype(jnp.float32) + s * (1.0 / size)
    o_ref[...] = out.astype(o_ref.dtype)


def _uniform_copy_kernel(idx_ref, x_ref, o_ref):
    """Row gather happens at the DMA level (input index_map reads idx_ref[j]),
    so the body is a plain copy of one gathered time row per grid step."""
    del idx_ref  # consumed only by the index_maps
    o_ref[...] = x_ref[...]


def _choose_window_blocks(bc, T, t_out, size, F, itemsize):
    """Pick (bB, kt): batch rows per block and output time rows per block."""
    row_bytes = F * itemsize
    full_in_bytes = T * row_bytes            # one batch row, full time axis
    if full_in_bytes <= _TARGET_IN_BYTES:
        # Full time per step, chunk over batch toward the byte target.
        bB = int(max(1, min(bc, _TARGET_IN_BYTES // full_in_bytes)))
        kt = t_out
    else:
        # Long clips: one batch row per step, tile time in multiples of 8
        # output rows so the input block's sublane extent stays a multiple of 8.
        bB = 1
        kt = int(max(8, (_TARGET_IN_BYTES // (size * row_bytes)) // 8 * 8))
        if kt >= t_out:
            kt = t_out

    # Guarantee >= 2 grid steps when possible so v7x's two TensorCores both get
    # work and the DMA pipeline has something to overlap with.
    if pl.cdiv(bc, bB) * pl.cdiv(t_out, kt) < 2:
        if bc >= 2:
            bB = (bc + 1) // 2
        elif t_out >= 16 and kt == t_out:
            kt = max(8, ((t_out // 2) // 8) * 8)
    return bB, kt


def _choose_uniform_batch_block(bc, t_out, F, itemsize):
    row_bytes = F * itemsize
    bB = int(max(1, min(bc, _TARGET_IN_BYTES // row_bytes)))
    if pl.cdiv(bc, bB) * t_out < 2 and bc >= 2:
        bB = (bc + 1) // 2
    return bB


def pooling_layer(x, pooling_type="max", factor=0.5):
    """Pallas implementation of PoolingLayer.forward.

    x: (B, C, T, F) array (C is 1 for mel spectrograms).
    Returns:
      max/avg/avg-max: (B, C, T // size, F) with size = T // int(T * factor)
      uniform:         (B, C, int(T * factor), F)
    """
    B, C, T, F = x.shape
    itemsize = x.dtype.itemsize
    fct = int(T * factor)

    # Fold B and the (size-1) channel dim into one fat leading axis.
    bc = B * C
    x3 = x.reshape(bc, T, F)

    if pooling_type == "uniform":
        # torch.linspace(0, T-1, fct) then int() truncation.
        # NOTE: np.linspace computes in f64 then rounds to f32 while torch
        # computes in f32; int() truncation could differ by +-1 index for very
        # large T -- verify against torch at the production T if it matters.
        idx_np = np.asarray(
            [int(v) for v in np.linspace(0.0, float(T - 1), fct, dtype=np.float32)],
            dtype=np.int32,
        )
        t_out = fct
        bB = _choose_uniform_batch_block(bc, t_out, F, itemsize)
        nb = pl.cdiv(bc, bB)
        blk_bytes = bB * F * itemsize

        grid_spec = pltpu.PrefetchScalarGridSpec(
            num_scalar_prefetch=1,
            grid=(nb, t_out),
            # DMA-level gather: only the selected time rows are read from HBM.
            in_specs=[
                pl.BlockSpec((bB, 1, F), lambda i, j, idx_ref: (i, idx_ref[j], 0))
            ],
            out_specs=pl.BlockSpec((bB, 1, F), lambda i, j, idx_ref: (i, j, 0)),
        )
        out3 = pl.pallas_call(
            _uniform_copy_kernel,
            out_shape=jax.ShapeDtypeStruct((bc, t_out, F), x.dtype),
            grid_spec=grid_spec,
            compiler_params=pltpu.CompilerParams(
                dimension_semantics=("parallel", "arbitrary"),
                vmem_limit_bytes=_vmem_limit(blk_bytes, blk_bytes),
            ),
        )(jnp.asarray(idx_np), x3)
        return out3.reshape(B, C, t_out, F)

    if pooling_type not in ("max", "avg", "avg-max"):
        raise ValueError(f"unknown pooling_type: {pooling_type}")

    size = T // fct
    # Floor behavior: trailing T - t_out*size rows are dropped, matching
    # F.max_pool2d / F.avg_pool2d with kernel_size == stride and no padding.
    t_out = T // size

    bB, kt = _choose_window_blocks(bc, T, t_out, size, F, itemsize)
    nb, nt = pl.cdiv(bc, bB), pl.cdiv(t_out, kt)

    if kt == t_out:
        # Single time block: read the full time axis (input block time dim ==
        # array dim, so the (8,128) tiling rule holds even for odd T).
        in_t = T
        in_idx = lambda i, t: (i, 0, 0)
    else:
        # kt is a multiple of 8 here, so kt*size is too.
        in_t = kt * size
        in_idx = lambda i, t: (i, t, 0)

    in_bytes = bB * in_t * F * itemsize
    out_bytes = bB * kt * F * itemsize

    kernel = functools.partial(
        _window_pool_kernel, pooling_type=pooling_type, size=size
    )
    out3 = pl.pallas_call(
        kernel,
        out_shape=jax.ShapeDtypeStruct((bc, t_out, F), x.dtype),
        grid=(nb, nt),
        in_specs=[pl.BlockSpec((bB, in_t, F), in_idx)],
        out_specs=pl.BlockSpec((bB, kt, F), lambda i, t: (i, t, 0)),
        compiler_params=pltpu.CompilerParams(
            dimension_semantics=("parallel", "parallel"),
            vmem_limit_bytes=_vmem_limit(in_bytes, out_bytes),
        ),
    )(x3)
    return out3.reshape(B, C, t_out, F)


def _reference(x, pooling_type="max", factor=0.5):
    """Plain-JAX reference mirroring the PyTorch semantics, for validation."""
    B, C, T, F = x.shape
    fct = int(T * factor)
    if pooling_type == "uniform":
        idx = [int(v) for v in np.linspace(0.0, float(T - 1), fct, dtype=np.float32)]
        return x[:, :, np.asarray(idx), :]
    size = T // fct
    t_out = T // size
    xr = x[:, :, : t_out * size, :].reshape(B, C, t_out, size, F)
    if pooling_type == "max":
        return jnp.max(xr, axis=3)
    if pooling_type == "avg":
        return jnp.mean(xr, axis=3)
    return jnp.max(xr, axis=3) + jnp.mean(xr, axis=3)  # avg-max


if __name__ == "__main__":
    key = jax.random.PRNGKey(0)
    k1, k2 = jax.random.split(key)

    # mel spectrograms: (batch, channel=1, time, freq=128)
    cases = [
        (jax.random.normal(k1, (2, 1, 16, 128), dtype=jnp.float32), 0.5),
        (jax.random.normal(k2, (3, 1, 10, 128), dtype=jnp.float32), 0.3),
    ]

    for x, factor in cases:
        for ptype in ("max", "avg", "avg-max", "uniform"):
            out = pooling_layer(x, pooling_type=ptype, factor=factor)
            out = jax.block_until_ready(out)
            ref = _reference(x, pooling_type=ptype, factor=factor)
            assert out.shape == ref.shape, (ptype, out.shape, ref.shape)
            np.testing.assert_allclose(
                np.asarray(out), np.asarray(ref), rtol=1e-6, atol=1e-6
            )

    print("KERNEL_OK")
</pallas_src>

<mosaic_0001>
module attributes {stable_mosaic.version = 11 : i64} {
  func.func @_window_pool_kernel(%arg0: i32, %arg1: i32, %arg2: memref<1x16x128xf32, #tpu.memory_space<vmem>>, %arg3: memref<1x8x128xf32, #tpu.memory_space<vmem>>) attributes {dimension_semantics = [#tpu.dimension_semantics<parallel>, #tpu.dimension_semantics<parallel>], iteration_bounds = array<i64: 2, 1>, scalar_prefetch = 0 : i64, scratch_operands = 0 : i64, tpu.core_type = #tpu.core_type<tc>, window_params = [{transform_indices = @transform_0, window_bounds = array<i64: 1, 16, 128>}, {transform_indices = @transform_1, window_bounds = array<i64: 1, 8, 128>}]} {
    %c0 = arith.constant 0 : index
    %c0_0 = arith.constant 0 : index
    %c0_1 = arith.constant 0 : index
    %0 = tpu.strided_load %arg2[%c0, %c0_0, %c0_1] {strides = array<i32: 1, 2, 1>} : memref<1x16x128xf32, #tpu.memory_space<vmem>>, vector<1x8x128xf32>
    %c0_2 = arith.constant 0 : index
    %c1 = arith.constant 1 : index
    %c0_3 = arith.constant 0 : index
    %1 = tpu.strided_load %arg2[%c0_2, %c1, %c0_3] {strides = array<i32: 1, 2, 1>} : memref<1x16x128xf32, #tpu.memory_space<vmem>>, vector<1x8x128xf32>
    %2 = arith.maximumf %0, %1 : vector<1x8x128xf32>
    %c0_4 = arith.constant 0 : index
    %c0_5 = arith.constant 0 : index
    %c0_6 = arith.constant 0 : index
    %3 = vector.load %arg3[%c0_4, %c0_5, %c0_6] : memref<1x8x128xf32, #tpu.memory_space<vmem>>, vector<1x8x128xf32>
    tpu.vector_store %arg3[%c0_4, %c0_5, %c0_6], %2 {strides = array<i32>} : memref<1x8x128xf32, #tpu.memory_space<vmem>>, vector<1x8x128xf32>,
    return
  }
  func.func @transform_0(%arg0: i32, %arg1: i32) -> (i32, i32, i32) {
    %c0_i32 = arith.constant 0 : i32
    %c0_i32_0 = arith.constant 0 : i32
    %c0_i32_1 = arith.constant 0 : i32
    return %arg0, %c0_i32, %c0_i32_0 : i32, i32, i32
  }
  func.func @transform_1(%arg0: i32, %arg1: i32) -> (i32, i32, i32) {
    %c0_i32 = arith.constant 0 : i32
    %c0_i32_0 = arith.constant 0 : i32
    return %arg0, %arg1, %c0_i32 : i32, i32, i32
  }
}

</mosaic_0001>

<bundles_post_ra>
// kernel: tpu_custom_call.1
= control target key start
LH: loop header
LB: loop body
LE: loop exit
PB: predicated region body
PF: predicated region fallthrough
CT: control target
= control target key end

     0   :  { %6 = vsyncpa [#allocation3], 0  ;;  %s585_s0 = inlined_call_operand.hbm [shape: f32[2,16,128], index: 0, kind: input, shape index: {}]   ;;  %s586_s1 = inlined_call_operand.hbm [shape: f32[2,8,128], index: 1, kind: output, shape index: {}]  }
   0x1   :  { %8 = vsyncpa [#allocation3 + $0x1], 0 }
   0x2   :  { %9 = vsyncpa [#allocation4], 0 }
   0x3   :  { %11 = vsyncpa [#allocation4 + $0x1], 0  ;;  %s452_s6 = smov 0   ;;  %s454_s7 = smov 0  }
   0x4   :  { %s456_s8 = smov 0   ;;  %s458_s9 = smov 0  }
   0x5   :  { %s460_s10 = smov 0   ;;  %s462_s11 = smov 0  }
   0x6 LB: > { %s248_s12 = sadd.s32 4294967295, %s436_s11   ;;  %s249_s13 = sadd.s32 4294967294, %s436_s11   ;;  %s436_s11 = sphi %s462_s11, %s17_s11   ;;  %s432_s10 = sphi %s460_s10, %s597_s10   ;;  %s428_s9 = sphi %s458_s9, %s596_s9   ;;  %s424_s8 = sphi %s456_s8, %s595_s8   ;;  %s420_s7 = sphi %s454_s7, %s594_s7   ;;  %s416_s6 = sphi %s452_s6, %s593_s6  }
   0x7   : > { %s29_s14 = sadd.s32 1, %s432_s10  ;;  %s36_s15 = sadd.s32 1, %s424_s8 }
   0x8   : > { %p31_p0 = scmp.ge.s32.totalorder %s29_s14, 2  ;;  %p43_p1 = scmp.ne.s32.totalorder %s424_s8, %s420_s7 }
   0x9   : > { %p44_p2 = scmp.eq.s32.totalorder %s436_s11, 0  ;;  %p49_p3 = scmp.ne.s32.totalorder %s420_s7, %s416_s6 }
   0xa   : > { %s599_s14 = smov (%p31_p0, %s29_s14), 0  ;;  %p50_p5 = scmp.eq.s32.totalorder %s248_s12, 0 }
   0xb   : > { %p493_p4 = por %p44_p2, %p43_p1  ;;  %s33_s17 = ssub.s32 %s432_s10, %s599_s14 }
   0xc   : > { %p75_p6 = scmp.eq.s32.totalorder %s248_s12, 1  ;;  %p34_p7 = scmp.eq.s32.totalorder %s33_s17, 0 }
   0xd   : > { %p499_p8 = por %p50_p5, %p49_p3  ;;  %p81_p10 = scmp.eq.s32.totalorder %s249_s13, 1 }
   0xe   : > { %p503_p9 = por %p75_p6, %p43_p1  ;;  %p276_p13 = scmp.lt.s32.totalorder %s436_s11, 2 }
   0xf   : > { %s508_s20 = scalar_select %p34_p7, %s424_s8, %s36_s15  }
  0x10   : > { %p510_p11 = por %p81_p10, %p49_p3  ;;  %s101_s22 = sand.u32 1, %s424_s8  }
  0x11   : > { %s252_s23 = sshll.u32 %s101_s22, 4  ;;  %s263_s24 = sshll.u32 %s432_s10, 8 }
  0x12   : > { %s111_s27 = scalar_lea.hbm %s585_s0, %s263_s24  ;;  %s105_s28 = scalar_lea.vmem [#allocation2], %s252_s23 }
  0x13   : > { %s112_s29 = sshll.u32 %s105_s28, 4  ;;  %p523_p0 = pnand %p276_p13, %p493_p4  ;;  %s113_s29 = int_to_ptr.vmem [resolvable:$true] %s112_s29 }
  0x14   : > { %p255_p1 = scmp.ge.s32.totalorder %s436_s11, 1  ;;  %s102_s2 = scalar_lea.sflag [#allocation3], %s101_s22 }
  0x15   : > { %p330_p2 = pneg %p523_p0  ;;  %s341_s3 = scalar_lea.vmem %s113_s29, 256 }
  0x16   : > { %p342_p3 = scmp.ne.s32.totalorder %s113_s29, %s341_s3  ;;  %s438_s4 = smov [#allocation2]  }
  0x17   : > { %s346_s5 = sshll.u32 %s438_s4, 4  ;;  %s347_s5 = int_to_ptr.vmem [resolvable:$false] %s346_s5 }
  0x18   : > { %p344_p5 = pnand %p342_p3, %p330_p2  ;;  %s348_s12 = scalar_lea.vmem %s347_s5, 512 }
  0x19   : > { %p349_p7 = scmp.lt.s32.totalorder %s113_s29, %s347_s5  ;;  %p350_p10 = scmp.lt.s32.totalorder %s348_s12, %s341_s3 }
  0x1a   : > { %p345_p6 = pneg %p344_p5 }
  0x1b   : > { %p351_p12 = por %p350_p10, %p349_p7 }
  0x1d   : > { %p352_p4 = pnand %p351_p12, %p345_p6 }
  0x1f   : > { %355 = shalt.err (!%p352_p4)
}
  0x20   : > { %s439_s13 = smov 128   ;;  %s440_s15 = smov 8  }
  0x21   : > { %271 = dma.hbm_to_vmem [thread:$0]  (!%p523_p0), %s111_s27, 256, %s113_s29, %s102_s2, %s439_s13, %s439_s13, %s440_s15  }
  0x22   : > { %p120_p13 = scmp.lt.s32.totalorder %s436_s11, 3 }
  0x24   : > { %p121_p2 = pnand %p255_p1, %p120_p13 }
  0x25   : > { %s536_s16 = sand.u32 (!%p121_p2), 1, %s420_s7  }
  0x26   : > { %124 = sbr.rel (%p121_p2) target bundleno = 68 (0x44), region = 24  ;;  %s256_s17 = sshll.u32 (!%p121_p2), %s536_s16, 4 }
  0x27   : > { %s127_s22 = scalar_lea.sflag (!%p121_p2), [#allocation3], %s536_s16  ;;  %s130_s23 = scalar_lea.vmem (!%p121_p2), [#allocation2], %s256_s17 }
  0x2b   : > { %407 = dma.done.wait (%p499_p8), %s127_s22, 256  }
  0x2c   : > { %409 = vsyncadd (%p499_p8), %s127_s22, 4294967040  ;;  %s257_s24 = sshll.u32 %s536_s16, 3  ;;  %s260_s27 = sshll.u32 %s428_s9, 7  ;;  %v149_v0 = vld [vmem:[%s130_s23] ss:$2 sm:$0xff] }
  0x2d   : > { %s148_s25 = scalar_lea.vmem [#allocation5], %s257_s24  ;;  %v258_v1 = vld [vmem:[%s130_s23 + $0x1] ss:$2 sm:$0xff]  ;;  %s167_s30 = scalar_lea.hbm %s586_s1, %s260_s27 }
  0x2e   : > { %s169_s26 = sshll.u32 %s148_s25, 4  ;;  %v152_v2 = vmax.f32 %v149_v0, %v258_v1  ;;  %s155_s2 = scalar_lea.sflag [#allocation4], %s536_s16  ;;  %s170_s26 = int_to_ptr.vmem [resolvable:$true] %s169_s26 }
  0x2f   : > { %s356_s18 = scalar_lea.vmem %s170_s26, 128  ;;  %s441_s3 = smov [#allocation5]  }
  0x30   : > { %153 = vst [vmem:[%s148_s25] sm:$0xff] %v152_v2  ;;  %p357_p8 = scmp.ne.s32.totalorder %s170_s26, %s356_s18  ;;  %s360_s4 = sshll.u32 %s441_s3, 4  ;;  %s361_s4 = int_to_ptr.vmem [resolvable:$false] %s360_s4 }
  0x31   : > { %s362_s5 = scalar_lea.vmem %s361_s4, 256  ;;  %p363_p1 = scmp.lt.s32.totalorder %s170_s26, %s361_s4 }
  0x32   : > { %p358_p12 = pnand %p357_p8, %p503_p9  ;;  %p364_p3 = scmp.lt.s32.totalorder %s362_s5, %s356_s18 }
  0x34   : > { %p359_p0 = pneg %p358_p12  ;;  %p365_p5 = por %p364_p3, %p363_p1 }
  0x36   : > { %p366_p6 = pnand %p365_p5, %p359_p0 }
  0x38   : > { %369 = shalt.err (!%p366_p6)
}
  0x39   : > { %s370_s9 = scalar_lea.hbm %s167_s30, 128  ;;  %s374_s15 = scalar_lea.hbm %s586_s1, 256 }
  0x3a   : > { %p371_p7 = scmp.ne.s32.totalorder %s167_s30, %s370_s9  ;;  %p375_p13 = scmp.lt.s32.totalorder %s167_s30, %s586_s1 }
  0x3b   : > { %p376_p2 = scmp.lt.s32.totalorder %s374_s15, %s370_s9 }
  0x3c   : > { %p372_p10 = pnand %p371_p7, %p503_p9 }
  0x3d   : > { %p377_p8 = por %p376_p2, %p375_p13 }
  0x3e   : > { %p373_p4 = pneg %p372_p10 }
  0x40   : > { %p378_p12 = pnand %p377_p8, %p373_p4 }
  0x42   : > { %381 = shalt.err (!%p378_p12)
}
  0x43   : > { %266 = dma.vmem_to_hbm [thread:$0]  (%p503_p9), %s170_s26, 128, %s167_s30, %s155_s2  }
  0x44 PF: > { %s181_s22 = sand.u32 1, %s416_s6   ;;  %p592_p0 = scmp.ge.s32.totalorder %s436_s11, 2 }
  0x45   : > { %s182_s23 = scalar_lea.sflag [#allocation4], %s181_s22 }
  0x46   : > { %p273_p1 = pnand %p592_p0, %p510_p11 }
  0x48   : > { %p274_p3 = pneg %p273_p1 }
  0x4a   : > { %411 = dma.done.wait (%p274_p3), %s182_s23, 128  }
  0x4b   : > { %413 = vsyncadd (%p274_p3), %s182_s23, 4294967168  ;;  %s17_s11 = sadd.s32 1, %s436_s11   ;;  %s593_s6 = smov %s420_s7 }
  0x4c   : > { %p14_p5 = scmp.ge.s32.totalorder %s17_s11, 4   ;;  %s594_s7 = smov %s424_s8 }
  0x4d   : > { %s595_s8 = smov %s508_s20  ;;  %s596_s9 = smov %s432_s10 }
  0x4e   : > { %s597_s10 = smov %s599_s14  ;;  %16 = sbr.rel (!%p14_p5) target bundleno = 6 (0x6), region = 70 }
  0x53   :  { %187 = vsyncpa [#allocation3], 1 }
  0x54   :  { %189 = vsyncpa [#allocation3 + $0x1], 1 }
  0x55   :  { %190 = vsyncpa [#allocation4], 1 }
  0x56   :  { %192 = vsyncpa [#allocation4 + $0x1], 1 }

</bundles_post_ra>
